<compile_context>
chip_gen: v6e
topology: v6e:2x2x1
jax: 0.10.0
libtpu: 0.0.40
codegen_flags: <defaults>
</compile_context>

<pallas_src>
from functools import partial

import numpy as np
import jax
import jax.numpy as jnp
from jax import lax
from jax.experimental import pallas as pl
from jax.experimental.pallas import tpu as pltpu


def mha_kernel(q_ref, k_ref, v_ref,
               wq_ref, wk_ref, wv_ref, wfc_ref,
               ln_g_ref, ln_b_ref,
               *rest,
               n_head, d_k, d_v, compute_dtype, return_attn):
    if return_attn:
        out_ref, attn_ref, o_scr = rest
    else:
        out_ref, o_scr = rest
        attn_ref = None

    # (N, D) activations for this batch element.
    q_in = q_ref[0]                      # residual-path dtype (f32)
    cq = q_in.astype(compute_dtype)      # single cast per batch element
    ck = k_ref[0]                        # already compute_dtype (wrapper cast)
    cv = v_ref[0]

    # Full-width projections, once per batch element.  The 1/sqrt(d_k)
    # temperature is pre-folded into Wq wrapper-side.
    qp = jnp.dot(cq, wq_ref[...], preferred_element_type=compute_dtype)  # (N, H*d_k)
    kp = jnp.dot(ck, wk_ref[...], preferred_element_type=compute_dtype)  # (N, H*d_k)
    vp = jnp.dot(cv, wv_ref[...], preferred_element_type=compute_dtype)  # (N, H*d_v)

    approx_recip = compute_dtype != jnp.float32

    # Static unroll over heads (n_head is small): static lane offsets make the
    # per-head slices and the o_scr column stores compile-time-constant ops.
    for h in range(n_head):
        qh = qp[:, h * d_k:(h + 1) * d_k]
        kh = kp[:, h * d_k:(h + 1) * d_k]
        vh = vp[:, h * d_v:(h + 1) * d_v]

        # scores[i, j] = sum_d qh[i, d] * kh[j, d] -- contraction on the last
        # dim of both operands; no explicit transpose / XLU relayout.
        scores = lax.dot_general(
            qh, kh, dimension_numbers=(((1,), (1,)), ((), ())),
            preferred_element_type=jnp.float32)                  # (N, N) f32

        # Numerically-stable softmax in f32; denominator on the EUP slot.
        m = jnp.max(scores, axis=-1, keepdims=True)
        e = jnp.exp(scores - m)
        s = jnp.sum(e, axis=-1, keepdims=True)
        attn = e * pl.reciprocal(s, approx=approx_recip)         # (N, N) f32

        if return_attn:
            attn_ref[0, h] = attn.astype(attn_ref.dtype)

        # Per-head context, written into its static column slot of the
        # (N, H*d_v) scratch so the fc projection runs as ONE deep matmul.
        o_h = jnp.dot(attn.astype(compute_dtype), vh,
                      preferred_element_type=compute_dtype)      # (N, d_v)
        o_scr[:, h * d_v:(h + 1) * d_v] = o_h

    # Fused output projection: contraction depth n_head*d_v (= d_model).
    fc = jnp.dot(o_scr[...], wfc_ref[...],
                 preferred_element_type=jnp.float32)             # (N, D) f32

    # Residual add + LayerNorm (eps = 1e-6) in f32.
    x = fc + q_in.astype(jnp.float32)
    mean = jnp.mean(x, axis=-1, keepdims=True)
    var = jnp.mean((x - mean) ** 2, axis=-1, keepdims=True)
    y = (x - mean) * lax.rsqrt(var + 1e-6)
    y = y * ln_g_ref[0] + ln_b_ref[0]
    out_ref[0] = y.astype(out_ref.dtype)


def _vmem_limit_bytes(N, D, n_head, d_k, d_v, q_dtype, compute_dtype,
                      attn_dtype, return_attn):
    """Explicit scoped-VMEM budget: 2x double-buffered blocks + scratch + slack."""
    cb = np.dtype(compute_dtype).itemsize
    qb = np.dtype(q_dtype).itemsize
    ab = np.dtype(attn_dtype).itemsize
    need = 0
    need += 2 * N * D * qb                                            # q block
    need += 2 * 2 * N * D * cb                                        # k, v blocks
    need += 2 * (2 * D * n_head * d_k + 2 * D * n_head * d_v) * cb    # Wq,Wk,Wv,Wfc
    need += 2 * 2 * D * 4                                             # ln gamma/beta
    need += 2 * N * D * qb                                            # out block
    if return_attn:
        need += 2 * n_head * N * N * ab                               # attn block
    need += N * n_head * d_v * cb                                     # o scratch
    need += 4 * N * N * 4                                             # transient scores tiles
    need += 4 << 20                                                   # spill / layout slack
    return int(min(max(need, 16 << 20), 64 << 20))                    # fits every chip gen


def multi_head_attention(q, k, v, params, *, n_head, d_k, d_v,
                         compute_dtype=jnp.bfloat16,
                         attn_dtype=jnp.bfloat16,
                         return_attn=False):
    """Pallas MHA forward.  Weights in `params` are pre-transposed to (in, out).

    Pass return_attn=True to reproduce the torch module's (out, attn) return;
    the production default skips the dominant H*N^2 attention-weight HBM write.
    """
    B, N, D = q.shape
    wq, wk, wv, wfc, ln_g, ln_b = params

    # Wrapper-side dtype / layout plumbing (done once, outside the kernel):
    # fold the softmax temperature into Wq, pre-cast weights and k/v to the
    # MXU compute dtype (q stays in its input dtype for the f32 residual).
    scale = 1.0 / (float(d_k) ** 0.5)
    wq_c = (wq * scale).astype(compute_dtype)
    wk_c = wk.astype(compute_dtype)
    wv_c = wv.astype(compute_dtype)
    wfc_c = wfc.astype(compute_dtype)
    k_c = k.astype(compute_dtype)
    v_c = v.astype(compute_dtype)

    kernel = partial(mha_kernel, n_head=n_head, d_k=d_k, d_v=d_v,
                     compute_dtype=compute_dtype, return_attn=return_attn)

    # NOTE: the weight BlockSpecs have constant index maps; a single-buffered
    # pipeline_mode would save a little VMEM but is left at the default here.
    in_specs = [
        pl.BlockSpec((1, N, D), lambda b: (b, 0, 0)),          # q (residual dtype)
        pl.BlockSpec((1, N, D), lambda b: (b, 0, 0)),          # k (compute dtype)
        pl.BlockSpec((1, N, D), lambda b: (b, 0, 0)),          # v (compute dtype)
        pl.BlockSpec((D, n_head * d_k), lambda b: (0, 0)),     # Wq (scale folded)
        pl.BlockSpec((D, n_head * d_k), lambda b: (0, 0)),     # Wk
        pl.BlockSpec((D, n_head * d_v), lambda b: (0, 0)),     # Wv
        pl.BlockSpec((n_head * d_v, D), lambda b: (0, 0)),     # Wfc
        pl.BlockSpec((1, D), lambda b: (0, 0)),                # ln gamma
        pl.BlockSpec((1, D), lambda b: (0, 0)),                # ln beta
    ]

    out_block = pl.BlockSpec((1, N, D), lambda b: (b, 0, 0))
    if return_attn:
        out_specs = [out_block,
                     pl.BlockSpec((1, n_head, N, N), lambda b: (b, 0, 0, 0))]
        out_shape = (jax.ShapeDtypeStruct((B, N, D), q.dtype),
                     jax.ShapeDtypeStruct((B, n_head, N, N), attn_dtype))
    else:
        out_specs = out_block
        out_shape = jax.ShapeDtypeStruct((B, N, D), q.dtype)

    grid_spec = pltpu.PrefetchScalarGridSpec(
        num_scalar_prefetch=0,
        grid=(B,),
        in_specs=in_specs,
        out_specs=out_specs,
        scratch_shapes=[pltpu.VMEM((N, n_head * d_v), compute_dtype)],
    )

    return pl.pallas_call(
        kernel,
        out_shape=out_shape,
        grid_spec=grid_spec,
        compiler_params=pltpu.CompilerParams(
            dimension_semantics=("parallel",),
            vmem_limit_bytes=_vmem_limit_bytes(
                N, D, n_head, d_k, d_v, q.dtype, compute_dtype,
                attn_dtype, return_attn)),
    )(q, k_c, v_c, wq_c, wk_c, wv_c, wfc_c, ln_g, ln_b)


def reference_mha(q, k, v, params, *, n_head, d_k, d_v):
    """Plain-JAX reference mirroring the PyTorch forward (eval mode)."""
    wq, wk, wv, wfc, ln_g, ln_b = params
    B, N, D = q.shape
    residual = q
    qp = (q @ wq).reshape(B, N, n_head, d_k).transpose(0, 2, 1, 3)
    kp = (k @ wk).reshape(B, N, n_head, d_k).transpose(0, 2, 1, 3)
    vp = (v @ wv).reshape(B, N, n_head, d_v).transpose(0, 2, 1, 3)
    scores = jnp.einsum("bhnd,bhmd->bhnm", qp / (d_k ** 0.5), kp)
    attn = jax.nn.softmax(scores, axis=-1)
    o = jnp.einsum("bhnm,bhmd->bhnd", attn, vp)
    o = o.transpose(0, 2, 1, 3).reshape(B, N, n_head * d_v)
    x = o @ wfc + residual
    mean = jnp.mean(x, axis=-1, keepdims=True)
    var = jnp.mean((x - mean) ** 2, axis=-1, keepdims=True)
    y = (x - mean) / jnp.sqrt(var + 1e-6)
    return y * ln_g[0] + ln_b[0], attn


if __name__ == "__main__":
    # Small shapes consistent with the module's (B, N, d_model) interface.
    B, N, D = 2, 8, 32
    n_head, d_k, d_v = 4, 8, 8

    key = jax.random.PRNGKey(0)
    ks = jax.random.split(key, 7)

    q = jax.random.normal(ks[0], (B, N, D), dtype=jnp.float32)
    k = jax.random.normal(ks[1], (B, N, D), dtype=jnp.float32)
    v = jax.random.normal(ks[2], (B, N, D), dtype=jnp.float32)

    # Deterministic parameter init (weights pre-transposed to (in, out)).
    wscale = 0.1
    wq = wscale * jax.random.normal(ks[3], (D, n_head * d_k), dtype=jnp.float32)
    wk = wscale * jax.random.normal(ks[4], (D, n_head * d_k), dtype=jnp.float32)
    wv = wscale * jax.random.normal(ks[5], (D, n_head * d_v), dtype=jnp.float32)
    wfc = wscale * jax.random.normal(ks[6], (n_head * d_v, D), dtype=jnp.float32)
    ln_g = jnp.ones((1, D), dtype=jnp.float32)   # LayerNorm default weight
    ln_b = jnp.zeros((1, D), dtype=jnp.float32)  # LayerNorm default bias
    params = (wq, wk, wv, wfc, ln_g, ln_b)

    out_gold, attn_gold = reference_mha(q, k, v, params,
                                        n_head=n_head, d_k=d_k, d_v=d_v)

    # 1) f32 compute path: strict check against the plain-JAX reference.
    out32, attn32 = multi_head_attention(
        q, k, v, params, n_head=n_head, d_k=d_k, d_v=d_v,
        compute_dtype=jnp.float32, attn_dtype=jnp.float32, return_attn=True)
    out32 = jax.block_until_ready(out32)
    attn32 = jax.block_until_ready(attn32)
    assert jnp.allclose(out32, out_gold, atol=2e-4, rtol=2e-4)
    assert jnp.allclose(attn32, attn_gold, atol=2e-4, rtol=2e-4)

    # 2) bf16 fast path (bf16 matmul operands, f32 softmax/LayerNorm) with
    #    bf16 attention storage; looser tolerance vs the f32 reference.
    out16, attn16 = multi_head_attention(
        q, k, v, params, n_head=n_head, d_k=d_k, d_v=d_v,
        compute_dtype=jnp.bfloat16, attn_dtype=jnp.bfloat16, return_attn=True)
    out16 = jax.block_until_ready(out16)
    attn16 = jax.block_until_ready(attn16)
    assert jnp.allclose(out16, out_gold, atol=7e-2, rtol=7e-2)
    assert jnp.allclose(attn16.astype(jnp.float32), attn_gold, atol=3e-2, rtol=3e-2)

    # 3) Production default: bf16 fast path, attention weights not materialized
    #    (skips the dominant H*N^2 HBM write).
    out_only = multi_head_attention(
        q, k, v, params, n_head=n_head, d_k=d_k, d_v=d_v)
    out_only = jax.block_until_ready(out_only)
    assert jnp.allclose(out_only, out_gold, atol=7e-2, rtol=7e-2)

    print("KERNEL_OK")
</pallas_src>

<mosaic_0001>
module attributes {stable_mosaic.version = 11 : i64} {
  func.func @mha_kernel(%arg0: i32, %arg1: memref<1x8x32xf32, #tpu.memory_space<vmem>>, %arg2: memref<1x8x32xf32, #tpu.memory_space<vmem>>, %arg3: memref<1x8x32xf32, #tpu.memory_space<vmem>>, %arg4: memref<32x32xf32, #tpu.memory_space<vmem>>, %arg5: memref<32x32xf32, #tpu.memory_space<vmem>>, %arg6: memref<32x32xf32, #tpu.memory_space<vmem>>, %arg7: memref<32x32xf32, #tpu.memory_space<vmem>>, %arg8: memref<1x32xf32, #tpu.memory_space<vmem>>, %arg9: memref<1x32xf32, #tpu.memory_space<vmem>>, %arg10: memref<1x8x32xf32, #tpu.memory_space<vmem>>, %arg11: memref<1x4x8x8xf32, #tpu.memory_space<vmem>>, %arg12: memref<8x32xf32, #tpu.memory_space<vmem>>) attributes {dimension_semantics = [#tpu.dimension_semantics<parallel>], iteration_bounds = array<i64: 2>, scalar_prefetch = 0 : i64, scratch_operands = 1 : i64, tpu.core_type = #tpu.core_type<tc>, window_params = [{transform_indices = @transform_0, window_bounds = array<i64: 1, 8, 32>}, {transform_indices = @transform_1, window_bounds = array<i64: 1, 8, 32>}, {transform_indices = @transform_2, window_bounds = array<i64: 1, 8, 32>}, {pipeline_mode = #tpu.pipeline_mode<synchronous>, transform_indices = @transform_3, window_bounds = array<i64: 32, 32>}, {pipeline_mode = #tpu.pipeline_mode<synchronous>, transform_indices = @transform_4, window_bounds = array<i64: 32, 32>}, {pipeline_mode = #tpu.pipeline_mode<synchronous>, transform_indices = @transform_5, window_bounds = array<i64: 32, 32>}, {pipeline_mode = #tpu.pipeline_mode<synchronous>, transform_indices = @transform_6, window_bounds = array<i64: 32, 32>}, {pipeline_mode = #tpu.pipeline_mode<synchronous>, transform_indices = @transform_7, window_bounds = array<i64: 1, 32>}, {pipeline_mode = #tpu.pipeline_mode<synchronous>, transform_indices = @transform_8, window_bounds = array<i64: 1, 32>}, {transform_indices = @transform_9, window_bounds = array<i64: 1, 8, 32>}, {transform_indices = @transform_10, window_bounds = array<i64: 1, 4, 8, 8>}]} {
    %c0 = arith.constant 0 : index
    %c0_0 = arith.constant 0 : index
    %c0_1 = arith.constant 0 : index
    %0 = vector.load %arg1[%c0, %c0_0, %c0_1] : memref<1x8x32xf32, #tpu.memory_space<vmem>>, vector<1x8x32xf32>
    %1 = vector.shape_cast %0 : vector<1x8x32xf32> to vector<8x32xf32>
    %c0_2 = arith.constant 0 : index
    %c0_3 = arith.constant 0 : index
    %c0_4 = arith.constant 0 : index
    %2 = vector.load %arg2[%c0_2, %c0_3, %c0_4] : memref<1x8x32xf32, #tpu.memory_space<vmem>>, vector<1x8x32xf32>
    %3 = vector.shape_cast %2 : vector<1x8x32xf32> to vector<8x32xf32>
    %c0_5 = arith.constant 0 : index
    %c0_6 = arith.constant 0 : index
    %c0_7 = arith.constant 0 : index
    %4 = vector.load %arg3[%c0_5, %c0_6, %c0_7] : memref<1x8x32xf32, #tpu.memory_space<vmem>>, vector<1x8x32xf32>
    %5 = vector.shape_cast %4 : vector<1x8x32xf32> to vector<8x32xf32>
    %c0_8 = arith.constant 0 : index
    %c0_9 = arith.constant 0 : index
    %6 = vector.load %arg4[%c0_8, %c0_9] : memref<32x32xf32, #tpu.memory_space<vmem>>, vector<32x32xf32>
    %cst = arith.constant dense<0.000000e+00> : vector<8x32xf32>
    %7 = tpu.matmul %1, %6, %cst {dimension_numbers = #tpu.dot_dimension_numbers<[1], [0], [0], [1], [0, 0, 1, 1], [], []>} : vector<8x32xf32>, vector<32x32xf32>, vector<8x32xf32> -> vector<8x32xf32>
    %c0_10 = arith.constant 0 : index
    %c0_11 = arith.constant 0 : index
    %8 = vector.load %arg5[%c0_10, %c0_11] : memref<32x32xf32, #tpu.memory_space<vmem>>, vector<32x32xf32>
    %cst_12 = arith.constant dense<0.000000e+00> : vector<8x32xf32>
    %9 = tpu.matmul %3, %8, %cst_12 {dimension_numbers = #tpu.dot_dimension_numbers<[1], [0], [0], [1], [0, 0, 1, 1], [], []>} : vector<8x32xf32>, vector<32x32xf32>, vector<8x32xf32> -> vector<8x32xf32>
    %c0_13 = arith.constant 0 : index
    %c0_14 = arith.constant 0 : index
    %10 = vector.load %arg6[%c0_13, %c0_14] : memref<32x32xf32, #tpu.memory_space<vmem>>, vector<32x32xf32>
    %cst_15 = arith.constant dense<0.000000e+00> : vector<8x32xf32>
    %11 = tpu.matmul %5, %10, %cst_15 {dimension_numbers = #tpu.dot_dimension_numbers<[1], [0], [0], [1], [0, 0, 1, 1], [], []>} : vector<8x32xf32>, vector<32x32xf32>, vector<8x32xf32> -> vector<8x32xf32>
    %12 = vector.extract_strided_slice %7 {offsets = [0, 0], sizes = [8, 8], strides = [1, 1]} : vector<8x32xf32> to vector<8x8xf32>
    %13 = vector.extract_strided_slice %9 {offsets = [0, 0], sizes = [8, 8], strides = [1, 1]} : vector<8x32xf32> to vector<8x8xf32>
    %14 = vector.extract_strided_slice %11 {offsets = [0, 0], sizes = [8, 8], strides = [1, 1]} : vector<8x32xf32> to vector<8x8xf32>
    %cst_16 = arith.constant dense<0.000000e+00> : vector<8x8xf32>
    %15 = tpu.matmul %12, %13, %cst_16 {dimension_numbers = #tpu.dot_dimension_numbers<[1], [1], [0], [0], [0, 0, 1, 0], [], []>} : vector<8x8xf32>, vector<8x8xf32>, vector<8x8xf32> -> vector<8x8xf32>
    %cst_17 = arith.constant dense<0xFF800000> : vector<8xf32>
    %16 = vector.multi_reduction <maximumf>, %15, %cst_17 [1] : vector<8x8xf32> to vector<8xf32>
    %17 = vector.shape_cast %16 : vector<8xf32> to vector<8x1xf32>
    %18 = vector.broadcast %17 : vector<8x1xf32> to vector<8x8xf32>
    %19 = arith.subf %15, %18 : vector<8x8xf32>
    %20 = math.exp %19 : vector<8x8xf32>
    %cst_18 = arith.constant dense<0.000000e+00> : vector<8xf32>
    %21 = vector.multi_reduction <add>, %20, %cst_18 [1] : vector<8x8xf32> to vector<8xf32>
    %22 = vector.shape_cast %21 : vector<8xf32> to vector<8x1xf32>
    %23 = tpu.reciprocal %22 : vector<8x1xf32> -> vector<8x1xf32>
    %24 = vector.broadcast %23 : vector<8x1xf32> to vector<8x8xf32>
    %25 = arith.mulf %20, %24 : vector<8x8xf32>
    %c0_19 = arith.constant 0 : index
    %c0_20 = arith.constant 0 : index
    %c0_21 = arith.constant 0 : index
    %c0_22 = arith.constant 0 : index
    %26 = vector.load %arg11[%c0_19, %c0_20, %c0_21, %c0_22] : memref<1x4x8x8xf32, #tpu.memory_space<vmem>>, vector<1x1x8x8xf32>
    %27 = vector.shape_cast %26 : vector<1x1x8x8xf32> to vector<8x8xf32>
    %28 = vector.shape_cast %25 : vector<8x8xf32> to vector<1x1x8x8xf32>
    tpu.vector_store %arg11[%c0_19, %c0_20, %c0_21, %c0_22], %28 {strides = array<i32>} : memref<1x4x8x8xf32, #tpu.memory_space<vmem>>, vector<1x1x8x8xf32>,
    %cst_23 = arith.constant dense<0.000000e+00> : vector<8x8xf32>
    %29 = tpu.matmul %25, %14, %cst_23 {dimension_numbers = #tpu.dot_dimension_numbers<[1], [0], [0], [1], [0, 0, 1, 1], [], []>} : vector<8x8xf32>, vector<8x8xf32>, vector<8x8xf32> -> vector<8x8xf32>
    %c0_24 = arith.constant 0 : index
    %c0_25 = arith.constant 0 : index
    %30 = vector.load %arg12[%c0_24, %c0_25] : memref<8x32xf32, #tpu.memory_space<vmem>>, vector<8x8xf32>
    tpu.vector_store %arg12[%c0_24, %c0_25], %29 {strides = array<i32>} : memref<8x32xf32, #tpu.memory_space<vmem>>, vector<8x8xf32>,
    %31 = vector.extract_strided_slice %7 {offsets = [0, 8], sizes = [8, 8], strides = [1, 1]} : vector<8x32xf32> to vector<8x8xf32>
    %32 = vector.extract_strided_slice %9 {offsets = [0, 8], sizes = [8, 8], strides = [1, 1]} : vector<8x32xf32> to vector<8x8xf32>
    %33 = vector.extract_strided_slice %11 {offsets = [0, 8], sizes = [8, 8], strides = [1, 1]} : vector<8x32xf32> to vector<8x8xf32>
    %cst_26 = arith.constant dense<0.000000e+00> : vector<8x8xf32>
    %34 = tpu.matmul %31, %32, %cst_26 {dimension_numbers = #tpu.dot_dimension_numbers<[1], [1], [0], [0], [0, 0, 1, 0], [], []>} : vector<8x8xf32>, vector<8x8xf32>, vector<8x8xf32> -> vector<8x8xf32>
    %cst_27 = arith.constant dense<0xFF800000> : vector<8xf32>
    %35 = vector.multi_reduction <maximumf>, %34, %cst_27 [1] : vector<8x8xf32> to vector<8xf32>
    %36 = vector.shape_cast %35 : vector<8xf32> to vector<8x1xf32>
    %37 = vector.broadcast %36 : vector<8x1xf32> to vector<8x8xf32>
    %38 = arith.subf %34, %37 : vector<8x8xf32>
    %39 = math.exp %38 : vector<8x8xf32>
    %cst_28 = arith.constant dense<0.000000e+00> : vector<8xf32>
    %40 = vector.multi_reduction <add>, %39, %cst_28 [1] : vector<8x8xf32> to vector<8xf32>
    %41 = vector.shape_cast %40 : vector<8xf32> to vector<8x1xf32>
    %42 = tpu.reciprocal %41 : vector<8x1xf32> -> vector<8x1xf32>
    %43 = vector.broadcast %42 : vector<8x1xf32> to vector<8x8xf32>
    %44 = arith.mulf %39, %43 : vector<8x8xf32>
    %c0_29 = arith.constant 0 : index
    %c1 = arith.constant 1 : index
    %c0_30 = arith.constant 0 : index
    %c0_31 = arith.constant 0 : index
    %45 = vector.load %arg11[%c0_29, %c1, %c0_30, %c0_31] : memref<1x4x8x8xf32, #tpu.memory_space<vmem>>, vector<1x1x8x8xf32>
    %46 = vector.shape_cast %45 : vector<1x1x8x8xf32> to vector<8x8xf32>
    %47 = vector.shape_cast %44 : vector<8x8xf32> to vector<1x1x8x8xf32>
    tpu.vector_store %arg11[%c0_29, %c1, %c0_30, %c0_31], %47 {strides = array<i32>} : memref<1x4x8x8xf32, #tpu.memory_space<vmem>>, vector<1x1x8x8xf32>,
    %cst_32 = arith.constant dense<0.000000e+00> : vector<8x8xf32>
    %48 = tpu.matmul %44, %33, %cst_32 {dimension_numbers = #tpu.dot_dimension_numbers<[1], [0], [0], [1], [0, 0, 1, 1], [], []>} : vector<8x8xf32>, vector<8x8xf32>, vector<8x8xf32> -> vector<8x8xf32>
    %c0_33 = arith.constant 0 : index
    %c8 = arith.constant 8 : index
    %49 = vector.load %arg12[%c0_33, %c8] : memref<8x32xf32, #tpu.memory_space<vmem>>, vector<8x8xf32>
    tpu.vector_store %arg12[%c0_33, %c8], %48 {strides = array<i32>} : memref<8x32xf32, #tpu.memory_space<vmem>>, vector<8x8xf32>,
    %50 = vector.extract_strided_slice %7 {offsets = [0, 16], sizes = [8, 8], strides = [1, 1]} : vector<8x32xf32> to vector<8x8xf32>
    %51 = vector.extract_strided_slice %9 {offsets = [0, 16], sizes = [8, 8], strides = [1, 1]} : vector<8x32xf32> to vector<8x8xf32>
    %52 = vector.extract_strided_slice %11 {offsets = [0, 16], sizes = [8, 8], strides = [1, 1]} : vector<8x32xf32> to vector<8x8xf32>
    %cst_34 = arith.constant dense<0.000000e+00> : vector<8x8xf32>
    %53 = tpu.matmul %50, %51, %cst_34 {dimension_numbers = #tpu.dot_dimension_numbers<[1], [1], [0], [0], [0, 0, 1, 0], [], []>} : vector<8x8xf32>, vector<8x8xf32>, vector<8x8xf32> -> vector<8x8xf32>
    %cst_35 = arith.constant dense<0xFF800000> : vector<8xf32>
    %54 = vector.multi_reduction <maximumf>, %53, %cst_35 [1] : vector<8x8xf32> to vector<8xf32>
    %55 = vector.shape_cast %54 : vector<8xf32> to vector<8x1xf32>
    %56 = vector.broadcast %55 : vector<8x1xf32> to vector<8x8xf32>
    %57 = arith.subf %53, %56 : vector<8x8xf32>
    %58 = math.exp %57 : vector<8x8xf32>
    %cst_36 = arith.constant dense<0.000000e+00> : vector<8xf32>
    %59 = vector.multi_reduction <add>, %58, %cst_36 [1] : vector<8x8xf32> to vector<8xf32>
    %60 = vector.shape_cast %59 : vector<8xf32> to vector<8x1xf32>
    %61 = tpu.reciprocal %60 : vector<8x1xf32> -> vector<8x1xf32>
    %62 = vector.broadcast %61 : vector<8x1xf32> to vector<8x8xf32>
    %63 = arith.mulf %58, %62 : vector<8x8xf32>
    %c0_37 = arith.constant 0 : index
    %c2 = arith.constant 2 : index
    %c0_38 = arith.constant 0 : index
    %c0_39 = arith.constant 0 : index
    %64 = vector.load %arg11[%c0_37, %c2, %c0_38, %c0_39] : memref<1x4x8x8xf32, #tpu.memory_space<vmem>>, vector<1x1x8x8xf32>
    %65 = vector.shape_cast %64 : vector<1x1x8x8xf32> to vector<8x8xf32>
    %66 = vector.shape_cast %63 : vector<8x8xf32> to vector<1x1x8x8xf32>
    tpu.vector_store %arg11[%c0_37, %c2, %c0_38, %c0_39], %66 {strides = array<i32>} : memref<1x4x8x8xf32, #tpu.memory_space<vmem>>, vector<1x1x8x8xf32>,
    %cst_40 = arith.constant dense<0.000000e+00> : vector<8x8xf32>
    %67 = tpu.matmul %63, %52, %cst_40 {dimension_numbers = #tpu.dot_dimension_numbers<[1], [0], [0], [1], [0, 0, 1, 1], [], []>} : vector<8x8xf32>, vector<8x8xf32>, vector<8x8xf32> -> vector<8x8xf32>
    %c0_41 = arith.constant 0 : index
    %c16 = arith.constant 16 : index
    %68 = vector.load %arg12[%c0_41, %c16] : memref<8x32xf32, #tpu.memory_space<vmem>>, vector<8x8xf32>
    tpu.vector_store %arg12[%c0_41, %c16], %67 {strides = array<i32>} : memref<8x32xf32, #tpu.memory_space<vmem>>, vector<8x8xf32>,
    %69 = vector.extract_strided_slice %7 {offsets = [0, 24], sizes = [8, 8], strides = [1, 1]} : vector<8x32xf32> to vector<8x8xf32>
    %70 = vector.extract_strided_slice %9 {offsets = [0, 24], sizes = [8, 8], strides = [1, 1]} : vector<8x32xf32> to vector<8x8xf32>
    %71 = vector.extract_strided_slice %11 {offsets = [0, 24], sizes = [8, 8], strides = [1, 1]} : vector<8x32xf32> to vector<8x8xf32>
    %cst_42 = arith.constant dense<0.000000e+00> : vector<8x8xf32>
    %72 = tpu.matmul %69, %70, %cst_42 {dimension_numbers = #tpu.dot_dimension_numbers<[1], [1], [0], [0], [0, 0, 1, 0], [], []>} : vector<8x8xf32>, vector<8x8xf32>, vector<8x8xf32> -> vector<8x8xf32>
    %cst_43 = arith.constant dense<0xFF800000> : vector<8xf32>
    %73 = vector.multi_reduction <maximumf>, %72, %cst_43 [1] : vector<8x8xf32> to vector<8xf32>
    %74 = vector.shape_cast %73 : vector<8xf32> to vector<8x1xf32>
    %75 = vector.broadcast %74 : vector<8x1xf32> to vector<8x8xf32>
    %76 = arith.subf %72, %75 : vector<8x8xf32>
    %77 = math.exp %76 : vector<8x8xf32>
    %cst_44 = arith.constant dense<0.000000e+00> : vector<8xf32>
    %78 = vector.multi_reduction <add>, %77, %cst_44 [1] : vector<8x8xf32> to vector<8xf32>
    %79 = vector.shape_cast %78 : vector<8xf32> to vector<8x1xf32>
    %80 = tpu.reciprocal %79 : vector<8x1xf32> -> vector<8x1xf32>
    %81 = vector.broadcast %80 : vector<8x1xf32> to vector<8x8xf32>
    %82 = arith.mulf %77, %81 : vector<8x8xf32>
    %c0_45 = arith.constant 0 : index
    %c3 = arith.constant 3 : index
    %c0_46 = arith.constant 0 : index
    %c0_47 = arith.constant 0 : index
    %83 = vector.load %arg11[%c0_45, %c3, %c0_46, %c0_47] : memref<1x4x8x8xf32, #tpu.memory_space<vmem>>, vector<1x1x8x8xf32>
    %84 = vector.shape_cast %83 : vector<1x1x8x8xf32> to vector<8x8xf32>
    %85 = vector.shape_cast %82 : vector<8x8xf32> to vector<1x1x8x8xf32>
    tpu.vector_store %arg11[%c0_45, %c3, %c0_46, %c0_47], %85 {strides = array<i32>} : memref<1x4x8x8xf32, #tpu.memory_space<vmem>>, vector<1x1x8x8xf32>,
    %cst_48 = arith.constant dense<0.000000e+00> : vector<8x8xf32>
    %86 = tpu.matmul %82, %71, %cst_48 {dimension_numbers = #tpu.dot_dimension_numbers<[1], [0], [0], [1], [0, 0, 1, 1], [], []>} : vector<8x8xf32>, vector<8x8xf32>, vector<8x8xf32> -> vector<8x8xf32>
    %c0_49 = arith.constant 0 : index
    %c24 = arith.constant 24 : index
    %87 = vector.load %arg12[%c0_49, %c24] : memref<8x32xf32, #tpu.memory_space<vmem>>, vector<8x8xf32>
    tpu.vector_store %arg12[%c0_49, %c24], %86 {strides = array<i32>} : memref<8x32xf32, #tpu.memory_space<vmem>>, vector<8x8xf32>,
    %c0_50 = arith.constant 0 : index
    %c0_51 = arith.constant 0 : index
    %88 = vector.load %arg12[%c0_50, %c0_51] : memref<8x32xf32, #tpu.memory_space<vmem>>, vector<8x32xf32>
    %c0_52 = arith.constant 0 : index
    %c0_53 = arith.constant 0 : index
    %89 = vector.load %arg7[%c0_52, %c0_53] : memref<32x32xf32, #tpu.memory_space<vmem>>, vector<32x32xf32>
    %cst_54 = arith.constant dense<0.000000e+00> : vector<8x32xf32>
    %90 = tpu.matmul %88, %89, %cst_54 {dimension_numbers = #tpu.dot_dimension_numbers<[1], [0], [0], [1], [0, 0, 1, 1], [], []>} : vector<8x32xf32>, vector<32x32xf32>, vector<8x32xf32> -> vector<8x32xf32>
    %91 = arith.addf %90, %1 : vector<8x32xf32>
    %cst_55 = arith.constant dense<0.000000e+00> : vector<8xf32>
    %92 = vector.multi_reduction <add>, %91, %cst_55 [1] : vector<8x32xf32> to vector<8xf32>
    %93 = vector.shape_cast %92 : vector<8xf32> to vector<8x1xf32>
    %cst_56 = arith.constant 3.200000e+01 : f32
    %94 = vector.broadcast %cst_56 : f32 to vector<8x1xf32>
    %95 = arith.divf %93, %94 : vector<8x1xf32>
    %96 = vector.broadcast %95 : vector<8x1xf32> to vector<8x32xf32>
    %97 = arith.subf %91, %96 : vector<8x32xf32>
    %98 = arith.mulf %97, %97 : vector<8x32xf32>
    %cst_57 = arith.constant dense<0.000000e+00> : vector<8xf32>
    %99 = vector.multi_reduction <add>, %98, %cst_57 [1] : vector<8x32xf32> to vector<8xf32>
    %100 = vector.shape_cast %99 : vector<8xf32> to vector<8x1xf32>
    %cst_58 = arith.constant 3.200000e+01 : f32
    %101 = vector.broadcast %cst_58 : f32 to vector<8x1xf32>
    %102 = arith.divf %100, %101 : vector<8x1xf32>
    %103 = vector.broadcast %95 : vector<8x1xf32> to vector<8x32xf32>
    %104 = arith.subf %91, %103 : vector<8x32xf32>
    %cst_59 = arith.constant 9.99999997E-7 : f32
    %105 = vector.broadcast %cst_59 : f32 to vector<8x1xf32>
    %106 = arith.addf %102, %105 : vector<8x1xf32>
    %107 = math.rsqrt %106 : vector<8x1xf32>
    %108 = vector.broadcast %107 : vector<8x1xf32> to vector<8x32xf32>
    %109 = arith.mulf %104, %108 : vector<8x32xf32>
    %c0_60 = arith.constant 0 : index
    %c0_61 = arith.constant 0 : index
    %110 = vector.load %arg8[%c0_60, %c0_61] : memref<1x32xf32, #tpu.memory_space<vmem>>, vector<1x32xf32>
    %111 = vector.shape_cast %110 : vector<1x32xf32> to vector<32xf32>
    %112 = vector.shape_cast %111 : vector<32xf32> to vector<1x32xf32>
    %113 = vector.broadcast %112 : vector<1x32xf32> to vector<8x32xf32>
    %114 = arith.mulf %109, %113 : vector<8x32xf32>
    %c0_62 = arith.constant 0 : index
    %c0_63 = arith.constant 0 : index
    %115 = vector.load %arg9[%c0_62, %c0_63] : memref<1x32xf32, #tpu.memory_space<vmem>>, vector<1x32xf32>
    %116 = vector.shape_cast %115 : vector<1x32xf32> to vector<32xf32>
    %117 = vector.shape_cast %116 : vector<32xf32> to vector<1x32xf32>
    %118 = vector.broadcast %117 : vector<1x32xf32> to vector<8x32xf32>
    %119 = arith.addf %114, %118 : vector<8x32xf32>
    %c0_64 = arith.constant 0 : index
    %c0_65 = arith.constant 0 : index
    %c0_66 = arith.constant 0 : index
    %120 = vector.load %arg10[%c0_64, %c0_65, %c0_66] : memref<1x8x32xf32, #tpu.memory_space<vmem>>, vector<1x8x32xf32>
    %121 = vector.shape_cast %120 : vector<1x8x32xf32> to vector<8x32xf32>
    %122 = vector.shape_cast %119 : vector<8x32xf32> to vector<1x8x32xf32>
    tpu.vector_store %arg10[%c0_64, %c0_65, %c0_66], %122 {strides = array<i32>} : memref<1x8x32xf32, #tpu.memory_space<vmem>>, vector<1x8x32xf32>,
    return
  }
  func.func @transform_0(%arg0: i32) -> (i32, i32, i32) {
    %c0_i32 = arith.constant 0 : i32
    %c0_i32_0 = arith.constant 0 : i32
    %c0_i32_1 = arith.constant 0 : i32
    return %arg0, %c0_i32, %c0_i32_0 : i32, i32, i32
  }
  func.func @transform_1(%arg0: i32) -> (i32, i32, i32) {
    %c0_i32 = arith.constant 0 : i32
    %c0_i32_0 = arith.constant 0 : i32
    %c0_i32_1 = arith.constant 0 : i32
    return %arg0, %c0_i32, %c0_i32_0 : i32, i32, i32
  }
  func.func @transform_2(%arg0: i32) -> (i32, i32, i32) {
    %c0_i32 = arith.constant 0 : i32
    %c0_i32_0 = arith.constant 0 : i32
    %c0_i32_1 = arith.constant 0 : i32
    return %arg0, %c0_i32, %c0_i32_0 : i32, i32, i32
  }
  func.func @transform_3(%arg0: i32) -> (i32, i32) {
    %c0_i32 = arith.constant 0 : i32
    %c0_i32_0 = arith.constant 0 : i32
    %c0_i32_1 = arith.constant 0 : i32
    return %c0_i32, %c0_i32_0 : i32, i32
  }
  func.func @transform_4(%arg0: i32) -> (i32, i32) {
    %c0_i32 = arith.constant 0 : i32
    %c0_i32_0 = arith.constant 0 : i32
    %c0_i32_1 = arith.constant 0 : i32
    return %c0_i32, %c0_i32_0 : i32, i32
  }
  func.func @transform_5(%arg0: i32) -> (i32, i32) {
    %c0_i32 = arith.constant 0 : i32
    %c0_i32_0 = arith.constant 0 : i32
    %c0_i32_1 = arith.constant 0 : i32
    return %c0_i32, %c0_i32_0 : i32, i32
  }
  func.func @transform_6(%arg0: i32) -> (i32, i32) {
    %c0_i32 = arith.constant 0 : i32
    %c0_i32_0 = arith.constant 0 : i32
    %c0_i32_1 = arith.constant 0 : i32
    return %c0_i32, %c0_i32_0 : i32, i32
  }
  func.func @transform_7(%arg0: i32) -> (i32, i32) {
    %c0_i32 = arith.constant 0 : i32
    %c0_i32_0 = arith.constant 0 : i32
    %c0_i32_1 = arith.constant 0 : i32
    return %c0_i32, %c0_i32_0 : i32, i32
  }
  func.func @transform_8(%arg0: i32) -> (i32, i32) {
    %c0_i32 = arith.constant 0 : i32
    %c0_i32_0 = arith.constant 0 : i32
    %c0_i32_1 = arith.constant 0 : i32
    return %c0_i32, %c0_i32_0 : i32, i32
  }
  func.func @transform_9(%arg0: i32) -> (i32, i32, i32) {
    %c0_i32 = arith.constant 0 : i32
    %c0_i32_0 = arith.constant 0 : i32
    %c0_i32_1 = arith.constant 0 : i32
    return %arg0, %c0_i32, %c0_i32_0 : i32, i32, i32
  }
  func.func @transform_10(%arg0: i32) -> (i32, i32, i32, i32) {
    %c0_i32 = arith.constant 0 : i32
    %c0_i32_0 = arith.constant 0 : i32
    %c0_i32_1 = arith.constant 0 : i32
    %c0_i32_2 = arith.constant 0 : i32
    return %arg0, %c0_i32, %c0_i32_0, %c0_i32_1 : i32, i32, i32, i32
  }
}

</mosaic_0001>

<bundles_post_ra>
// kernel: tpu_custom_call.1
= control target key start
LH: loop header
LB: loop body
LE: loop exit
PB: predicated region body
PF: predicated region fallthrough
CT: control target
= control target key end

     0   :  { %s2861_s0 = inlined_call_operand.hbm [shape: f32[2,8,32], index: 0, kind: input, shape index: {}]   ;;  %s2862_s1 = inlined_call_operand.hbm [shape: f32[2,8,32], index: 1, kind: input, shape index: {}]   ;;  %s2863_s2 = inlined_call_operand.hbm [shape: f32[2,8,32], index: 2, kind: input, shape index: {}]   ;;  %s2864_s3 = inlined_call_operand.hbm [shape: f32[32,32], index: 3, kind: input, shape index: {}]   ;;  %s2865_s4 = inlined_call_operand.hbm [shape: f32[32,32], index: 4, kind: input, shape index: {}]   ;;  %s2866_s5 = inlined_call_operand.hbm [shape: f32[32,32], index: 5, kind: input, shape index: {}]   ;;  %s2867_s6 = inlined_call_operand.hbm [shape: f32[32,32], index: 6, kind: input, shape index: {}]   ;;  %s2868_s7 = inlined_call_operand.vmem [shape: f32[1,32], index: 7, kind: input, shape index: {}]   ;;  %s2869_s8 = inlined_call_operand.vmem [shape: f32[1,32], index: 8, kind: input, shape index: {}]   ;;  %s2870_s9 = inlined_call_operand.hbm [shape: f32[2,8,32], index: 9, kind: output, shape index: {0}]   ;;  %s2871_s10 = inlined_call_operand.hbm [shape: f32[2,4,8,8], index: 10, kind: output, shape index: {1}]  }
   0x1   :  { %2892 = sst [smem:[#allocation29_spill]] %s2861_s0 }
   0x2   :  { %2893 = sst [smem:[#allocation30_spill]] %s2862_s1 }
   0x3   :  { %2894 = sst [smem:[#allocation31_spill]] %s2864_s3 }
   0x4   :  { %2895 = sst [smem:[#allocation32_spill]] %s2866_s5 }
   0x5   :  { %2896 = sst [smem:[#allocation33_spill]] %s2870_s9 }
   0x6   :  { %16 = vsyncpa [#allocation4], 0 }
   0x7   :  { %18 = vsyncpa [#allocation4 + $0x1], 0 }
   0x8   :  { %19 = vsyncpa [#allocation7], 0 }
   0x9   :  { %21 = vsyncpa [#allocation7 + $0x1], 0 }
   0xa   :  { %22 = vsyncpa [#allocation10], 0 }
   0xb   :  { %23 = vsyncpa [#allocation13], 0 }
   0xc   :  { %24 = vsyncpa [#allocation5], 0 }
   0xd   :  { %26 = vsyncpa [#allocation5 + $0x1], 0 }
   0xe   :  { %27 = vsyncpa [#allocation17], 0 }
   0xf   :  { %29 = vsyncpa [#allocation17 + $0x1], 0  ;;  %s2434_s13 = smov 0   ;;  %s2436_s14 = smov 0  }
  0x10   :  { %s2438_s15 = smov 0   ;;  %s2440_s16 = smov 0  }
  0x11 LB: > { %2897 = sst [smem:[#allocation24_spill]] %s2345_s13  ;;  %s2359_s17 = smov [#allocation9]   ;;  %s2357_s16 = sphi %s2440_s16, %s2933_s16   ;;  %s2353_s15 = sphi %s2438_s15, %s2937_s15   ;;  %s2349_s14 = sphi %s2436_s14, %s2936_s14   ;;  %s2345_s13 = sphi %s2434_s13, %s2935_s13  }
  0x12   : > { %2898 = sst [smem:[#allocation25_spill]] %s2357_s16  ;;  %s308_s18 = sshll.u32 %s2359_s17, 4  ;;  %s309_s18 = int_to_ptr.vmem [resolvable:$true] %s308_s18 }
  0x13   : > { %s2455_s19 = sadd.s32 4294967295, %s2357_s16   ;;  %p1761_p0 = scmp.ge.s32.totalorder %s2357_s16, 1 }
  0x14   : > { %p2884_p1 = scmp.eq.s32.totalorder %s2455_s19, 0  ;;  %p296_p2 = scmp.lt.s32.totalorder %s2357_s16, 3 }
  0x15   : > { %s2360_s21 = smov [#allocation12]   ;;  %s2074_s24 = scalar_lea.vmem %s309_s18, 512 }
  0x16   : > { %p2460_p3 = pnand %p1761_p0, %p296_p2  ;;  %s334_s22 = sshll.u32 %s2360_s21, 4  ;;  %s335_s22 = int_to_ptr.vmem [resolvable:$true] %s334_s22 }
  0x17   : > { %p2075_p8 = scmp.ne.s32.totalorder %s309_s18, %s2074_s24  ;;  %p2082_p11 = scmp.lt.s32.totalorder %s309_s18, %s309_s18 }
  0x18   : > { %s2899_s20 = scalar_select %p2460_p3, 1, 0 }
  0x19   : > { %p1958_p5 = pneg %p2460_p3  ;;  %p2083_p12 = scmp.lt.s32.totalorder %s2074_s24, %s2074_s24 }
  0x1b   : > { %p2469_p6 = pnand %p1958_p5, %p2884_p1  ;;  %p2084_p13 = por %p2083_p12, %p2082_p11 }
  0x1d   : > { %s2900_s23 = scalar_select %p2469_p6, 1, 0 }
  0x1e   : > { %p2872_p7 = pneg %p2469_p6 }
  0x20   : > { %p2077_p9 = pnand %p2075_p8, %p2872_p7 }
  0x22   : > { %p2078_p10 = pneg %p2077_p9 }
  0x24   : > { %p2085_p0 = pnand %p2084_p13, %p2078_p10 }
  0x26   : > { %2088 = shalt.err (!%p2085_p0)
}
  0x27   : > { %s2873_s25 = smov 128   ;;  %s2875_s26 = smov 8  }
  0x28   : > { %s2901_s3 = sld [smem:[#allocation31_spill]]  ;;  %s2100_s29 = scalar_lea.vmem %s335_s22, 512 }
  0x29   : > { %p2101_p2 = scmp.ne.s32.totalorder %s335_s22, %s2100_s29  ;;  %p2108_p9 = scmp.lt.s32.totalorder %s335_s22, %s335_s22 }
  0x2a   : > { %p2109_p10 = scmp.lt.s32.totalorder %s2100_s29, %s2100_s29 }
  0x2b   : > { %p2103_p5 = pnand %p2101_p2, %p2872_p7 }
  0x2c   : > { %p2110_p11 = por %p2109_p10, %p2108_p9 }
  0x2d   : > { %p2104_p8 = pneg %p2103_p5 }
  0x2e   : > { %1961 = dma.hbm_to_vmem [thread:$0]  (!%p2469_p6), %s2901_s3, 512, %s309_s18, [#allocation10], %s2873_s25, %s2873_s25, %s2875_s26  }
  0x2f   : > { %p2111_p12 = pnand %p2110_p11, %p2104_p8 }
  0x31   : > { %2114 = shalt.err (!%p2111_p12)
}
  0x32   : > { %s2902_s5 = sld [smem:[#allocation32_spill]]  ;;  %s1760_s12 = sadd.s32 4294967294, %s2357_s16  }
  0x33   : > { %s2499_s17 = sadd.s32 1, %s2357_s16   ;;  %s42_s21 = sadd.s32 1, %s2353_s15 }
  0x34   : > { %2903 = sst [smem:[#allocation26_spill]] %s2499_s17  ;;  %s39_s18 = ssub.s32 %s2357_s16, %s2499_s17 }
  0x35   : > { %p40_p13 = scmp.eq.s32.totalorder %s39_s18, 0  ;;  %p49_p0 = scmp.ne.s32.totalorder %s2353_s15, %s2349_s14 }
  0x36   : > { %p50_p2 = scmp.eq.s32.totalorder %s2357_s16, 0  ;;  %p55_p5 = scmp.ne.s32.totalorder %s2349_s14, %s2345_s13 }
  0x37   : > { %s2510_s24 = scalar_select %p40_p13, %s2353_s15, %s42_s21  }
  0x38   : > { %1967 = dma.hbm_to_vmem [thread:$0]  (!%p2469_p6), %s2902_s5, 512, %s335_s22, [#allocation13], %s2873_s25, %s2873_s25, %s2875_s26  }
  0x39   : > { %2904 = sst [smem:[#allocation27_spill]] %s2510_s24  ;;  %p51_p8 = por %p50_p2, %p49_p0 }
  0x3a   : > { %p2514_p9 = por %p2884_p1, %p55_p5  ;;  %p257_p10 = scmp.eq.s32.totalorder %s2455_s19, 1 }
  0x3b   : > { %p263_p11 = scmp.eq.s32.totalorder %s1760_s12, 1  ;;  %p1992_p12 = scmp.lt.s32.totalorder %s2357_s16, 2 }
  0x3c   : > { %s2905_s27 = scalar_select %p2514_p9, 1, 0 }
  0x3d   : > { %s2877_s22 = sand.u32 1, %s2353_s15   ;;  %p2521_p4 = por %p257_p10, %p49_p0 }
  0x3e   : > { %p2525_p7 = por %p263_p11, %p55_p5  ;;  %s2531_s30 = sshll.u32 %s2877_s22, 3 }
  0x3f   : > { %s2906_s28 = scalar_select %p2521_p4, 1, 0 }
  0x40   : > { %s2907_s29 = scalar_select %p2525_p7, 1, 0 }
  0x41   : > { %s2534_s11 = sshll.u32 %s2357_s16, 7  ;;  %p2536_p13 = pnand %p1992_p12, %p51_p8 }
  0x42   : > { %2908 = sst [smem:[#allocation28_spill]] %s2907_s29  ;;  %s385_s12 = sand.u32 1, %s2357_s16  }
  0x43   : > { %s2910_s1 = sld [smem:[#allocation30_spill]]  ;;  %s389_s22 = scalar_lea.vmem [#allocation6], %s2531_s30 }
  0x44   : > { %s396_s3 = sshll.u32 %s389_s22, 4  ;;  %s2363_s5 = smov [#allocation11]   ;;  %s2548_s3 = int_to_ptr.vmem [resolvable:$true] %s396_s3 }
  0x45   : > { %s321_s24 = sshll.u32 %s2363_s5, 4  ;;  %s2550_s17 = scalar_lea.sflag [#allocation7], %s385_s12  ;;  %s322_s24 = int_to_ptr.vmem [resolvable:$true] %s321_s24 }
  0x46   : > { %p2556_p2 = pneg %p2536_p13 }
  0x48   : > { %s2911_s16 = scalar_select %p2556_p2, 1, 0 }
  0x49   : > { %s2545_s26 = scalar_lea.hbm %s2910_s1, %s2534_s11  ;;  %s2120_s22 = scalar_lea.hbm %s2910_s1, 256 }
  0x4a   : > { %s2115_s29 = scalar_lea.hbm %s2545_s26, 128  ;;  %p2121_p10 = scmp.lt.s32.totalorder %s2545_s26, %s2910_s1 }
  0x4b   : > { %p2116_p0 = scmp.ne.s32.totalorder %s2545_s26, %s2115_s29  ;;  %p2122_p11 = scmp.lt.s32.totalorder %s2120_s22, %s2115_s29 }
  0x4d   : > { %p2118_p5 = pnand %p2556_p2, %p2116_p0  ;;  %p2123_p12 = por %p2122_p11, %p2121_p10 }
  0x4f   : > { %p2119_p8 = pneg %p2118_p5 }
  0x51   : > { %p2124_p1 = pnand %p2123_p12, %p2119_p8 }
  0x53   : > { %2127 = shalt.err (!%p2124_p1)
}
  0x54   : > { %s2128_s5 = scalar_lea.vmem %s2548_s3, 128  ;;  %s2364_s12 = smov [#allocation6]  }
  0x55   : > { %p2129_p7 = scmp.ne.s32.totalorder %s2548_s3, %s2128_s5  ;;  %s2133_s25 = sshll.u32 %s2364_s12, 4  ;;  %s2134_s25 = int_to_ptr.vmem [resolvable:$false] %s2133_s25 }
  0x56   : > { %s2135_s21 = scalar_lea.vmem %s2134_s25, 256  ;;  %p2136_p4 = scmp.lt.s32.totalorder %s2548_s3, %s2134_s25 }
  0x57   : > { %p2131_p0 = pnand %p2129_p7, %p2556_p2  ;;  %p2137_p9 = scmp.lt.s32.totalorder %s2135_s21, %s2128_s5 }
  0x59   : > { %p2132_p5 = pneg %p2131_p0  ;;  %p2138_p3 = por %p2137_p9, %p2136_p4 }
  0x5b   : > { %p2139_p6 = pnand %p2138_p3, %p2132_p5 }
  0x5d   : > { %2142 = shalt.err (!%p2139_p6)
}
  0x5e   : > { %1977 = dma.hbm_to_vmem [thread:$0]  (!%p2536_p13), %s2545_s26, 128, %s2548_s3, %s2550_s17  }
  0x5f   : > { %s2154_s9 = scalar_lea.vmem %s322_s24, 512  ;;  %p2912_p7 = scmp.ne.s32.totalorder %s2900_s23, 0 }
  0x60   : > { %p2155_p1 = scmp.ne.s32.totalorder %s322_s24, %s2154_s9  ;;  %p2162_p12 = scmp.lt.s32.totalorder %s322_s24, %s322_s24 }
  0x61   : > { %p2913_p8 = pneg %p2912_p7  ;;  %p2163_p0 = scmp.lt.s32.totalorder %s2154_s9, %s2154_s9 }
  0x63   : > { %p2157_p10 = pnand %p2155_p1, %p2913_p8  ;;  %p2164_p2 = por %p2163_p0, %p2162_p12 }
  0x65   : > { %p2158_p11 = pneg %p2157_p10 }
  0x67   : > { %p2165_p4 = pnand %p2164_p2, %p2158_p11 }
  0x69   : > { %2168 = shalt.err (!%p2165_p4)
}
  0x6a   : > { %s2914_s13 = smov 8   ;;  %s2915_s29 = smov 128  }
  0x6b   : > { %1964 = dma.hbm_to_vmem [thread:$0]  (!%p2912_p7), %s2865_s4, 512, %s322_s24, [#allocation10], %s2915_s29, %s2915_s29, %s2914_s13  }
  0x6c   : > { %s2365_s3 = smov [#allocation14]   ;;  %p2916_p6 = pmov %p2913_p8 }
  0x6d   : > { %s347_s26 = sshll.u32 %s2365_s3, 4  ;;  %s348_s26 = int_to_ptr.vmem [resolvable:$true] %s347_s26 }
  0x6e   : > { %s2180_s12 = scalar_lea.vmem %s348_s26, 512  ;;  %p2188_p5 = scmp.lt.s32.totalorder %s348_s26, %s348_s26 }
  0x6f   : > { %p2181_p3 = scmp.ne.s32.totalorder %s348_s26, %s2180_s12  ;;  %p2189_p1 = scmp.lt.s32.totalorder %s2180_s12, %s2180_s12 }
  0x71   : > { %p2183_p9 = pnand %p2181_p3, %p2916_p6  ;;  %p2190_p8 = por %p2189_p1, %p2188_p5 }
  0x73   : > { %p2184_p2 = pneg %p2183_p9 }
  0x75   : > { %p2191_p10 = pnand %p2190_p8, %p2184_p2 }
  0x77   : > { %2194 = shalt.err (!%p2191_p10)
}
  0x78   : > { %1970 = dma.hbm_to_vmem [thread:$0]  (!%p2912_p7), %s2867_s6, 512, %s348_s26, [#allocation13], %s2915_s29, %s2915_s29, %s2914_s13  }
  0x79   : > { %s2917_s0 = sld [smem:[#allocation29_spill]]  ;;  %s371_s23 = scalar_lea.vmem [#allocation3], %s2531_s30 }
  0x7a   : > { %s378_s5 = sshll.u32 %s371_s23, 4  ;;  %s2918_s3 = sand.u32 1, %s2353_s15   ;;  %s379_s5 = int_to_ptr.vmem [resolvable:$true] %s378_s5 }
  0x7b   : > { %s368_s12 = scalar_lea.sflag [#allocation4], %s2918_s3  ;;  %p2919_p12 = scmp.ne.s32.totalorder %s2911_s16, 0 }
  0x7f   : > { %s2605_s22 = scalar_lea.hbm %s2917_s0, %s2534_s11  ;;  %s2200_s29 = scalar_lea.hbm %s2917_s0, 256 }
  0x80   : > { %s2195_s1 = scalar_lea.hbm %s2605_s22, 128  ;;  %p2201_p7 = scmp.lt.s32.totalorder %s2605_s22, %s2917_s0 }
  0x81   : > { %p2196_p11 = scmp.ne.s32.totalorder %s2605_s22, %s2195_s1  ;;  %p2202_p3 = scmp.lt.s32.totalorder %s2200_s29, %s2195_s1 }
  0x83   : > { %p2198_p0 = pnand %p2196_p11, %p2919_p12  ;;  %p2203_p6 = por %p2202_p3, %p2201_p7 }
  0x85   : > { %p2199_p4 = pneg %p2198_p0 }
  0x87   : > { %p2204_p9 = pnand %p2203_p6, %p2199_p4 }
  0x89   : > { %2207 = shalt.err (!%p2204_p9)
}
  0x8a   : > { %s2208_s21 = scalar_lea.vmem %s379_s5, 128  ;;  %s2366_s9 = smov [#allocation3]  }
  0x8b   : > { %p2209_p2 = scmp.ne.s32.totalorder %s379_s5, %s2208_s21  ;;  %s2213_s23 = sshll.u32 %s2366_s9, 4  ;;  %s2214_s23 = int_to_ptr.vmem [resolvable:$false] %s2213_s23 }
  0x8c   : > { %s2215_s3 = scalar_lea.vmem %s2214_s23, 256  ;;  %p2216_p8 = scmp.lt.s32.totalorder %s379_s5, %s2214_s23 }
  0x8d   : > { %p2211_p5 = pnand %p2209_p2, %p2919_p12  ;;  %p2217_p10 = scmp.lt.s32.totalorder %s2215_s3, %s2208_s21 }
  0x8f   : > { %p2212_p1 = pneg %p2211_p5  ;;  %p2218_p11 = por %p2217_p10, %p2216_p8 }
  0x91   : > { %p2219_p0 = pnand %p2218_p11, %p2212_p1 }
  0x93   : > { %2222 = shalt.err (!%p2219_p0)
}
  0x94   : > { %1974 = dma.hbm_to_vmem [thread:$0]  (!%p2536_p13), %s2605_s22, 128, %s379_s5, %s368_s12  }
  0x95   : > { %s412_s13 = scalar_lea.hbm %s2863_s2, %s2534_s11  ;;  %s407_s29 = scalar_lea.vmem [#allocation8], %s2531_s30 }
  0x96   : > { %s414_s26 = sshll.u32 %s407_s29, 4  ;;  %s2223_s25 = scalar_lea.hbm %s412_s13, 128  ;;  %s415_s26 = int_to_ptr.vmem [resolvable:$true] %s414_s26 }
  0x97   : > { %p2224_p4 = scmp.ne.s32.totalorder %s412_s13, %s2223_s25  ;;  %s2228_s23 = scalar_lea.hbm %s2863_s2, 256 }
  0x98   : > { %p2229_p6 = scmp.lt.s32.totalorder %s412_s13, %s2863_s2  ;;  %p2230_p9 = scmp.lt.s32.totalorder %s2228_s23, %s2223_s25 }
  0x99   : > { %p2226_p7 = pnand %p2224_p4, %p2919_p12 }
  0x9a   : > { %p2231_p2 = por %p2230_p9, %p2229_p6 }
  0x9b   : > { %p2227_p3 = pneg %p2226_p7 }
  0x9d   : > { %p2232_p5 = pnand %p2231_p2, %p2227_p3 }
  0x9f   : > { %2235 = shalt.err (!%p2232_p5)
}
  0xa0   : > { %s2236_s30 = scalar_lea.vmem %s415_s26, 128  ;;  %s2367_s11 = smov [#allocation8]  }
  0xa1   : > { %p2237_p1 = scmp.ne.s32.totalorder %s415_s26, %s2236_s30  ;;  %s2241_s22 = sshll.u32 %s2367_s11, 4  ;;  %s2242_s22 = int_to_ptr.vmem [resolvable:$false] %s2241_s22 }
  0xa2   : > { %s2243_s5 = scalar_lea.vmem %s2242_s22, 256  ;;  %p2244_p11 = scmp.lt.s32.totalorder %s415_s26, %s2242_s22 }
  0xa3   : > { %p2239_p8 = pnand %p2237_p1, %p2919_p12  ;;  %p2245_p0 = scmp.lt.s32.totalorder %s2243_s5, %s2236_s30 }
  0xa5   : > { %p2240_p10 = pneg %p2239_p8  ;;  %p2246_p4 = por %p2245_p0, %p2244_p11 }
  0xa7   : > { %p2247_p7 = pnand %p2246_p4, %p2240_p10 }
  0xa9   : > { %2250 = shalt.err (!%p2247_p7)
}
  0xaa   : > { %1980 = dma.hbm_to_vmem [thread:$0]  (!%p2536_p13), %s412_s13, 128, %s415_s26, %s2550_s17  }
  0xab   : > { %p2920_p3 = scmp.ne.s32.totalorder %s2899_s20, 0 }
  0xac   : > { %s2647_s0 = sand.u32 (!%p2920_p3), 1, %s2349_s14   ;;  %p2921_p12 = scmp.ne.s32.totalorder (!%p2920_p3), %s2905_s27, 0 }
  0xad   : > { %423 = sbr.rel (%p2920_p3) target bundleno = 2306 (0x902), region = 56  ;;  %s2650_s16 = sshll.u32 (!%p2920_p3), %s2647_s0, 3 }
  0xae   : > { %s426_s12 = scalar_lea.sflag (!%p2920_p3), [#allocation4], %s2647_s0  ;;  %s429_s1 = scalar_lea.vmem (!%p2920_p3), [#allocation3], %s2650_s16 }
  0xb2   : > { %2320 = dma.done.wait (%p2921_p12), %s426_s12, 128  }
  0xb3   : > { %2322 = vsyncadd (%p2921_p12), %s426_s12, 4294967168  ;;  %s434_s20 = sand.u32 1, %s2455_s19   ;;  %s438_s18 = scalar_lea.vmem [#allocation6], %s2650_s16 }
  0xb4   : > { %s435_s17 = scalar_lea.sflag [#allocation7], %s434_s20 }
  0xb5   : > { %2324 = dma.done.wait (%p2921_p12), %s435_s17, 256  }
  0xb6   : > { %2326 = vsyncadd (%p2921_p12), %s435_s17, 4294967040  ;;  %s447_s24 = scalar_lea.vmem [#allocation8], %s2650_s16  ;;  %p2922_p13 = scmp.eq.s32.totalorder %s2455_s19, 0 }
  0xb8   : > { %2328 = dma.done.wait (%p2922_p13), [#allocation10], 1024   ;;  %p2923_p6 = pmov %p2922_p13 }
  0xba   : > { %2330 = vsyncadd (%p2923_p6), [#allocation10], 4294966272  ;;  %p2924_p9 = pmov %p2923_p6 }
  0xbb   : > { %p2925_p2 = pmov %p2923_p6 }
  0xbc   : > { %2332 = dma.done.wait (%p2924_p9), [#allocation13], 1024  }
  0xbd   : > { %2334 = vsyncadd (%p2925_p2), [#allocation13], 4294966272  ;;  %v2368_v0 = vmov 0.0   ;;  %vm2369_vm0 = vmmov 0   ;;  %v599_v1 = vld [vmem:[#allocation11 + $0x18] sm:$0xff]  ;;  %v598_v3 = vld [vmem:[#allocation11 + $0x10] sm:$0xff] }
  0xbe   : > { %1859 = vmatprep.subr.mxu1 %v2368_v0  ;;  %1848 = vmatprep.subr.mxu0 %v2368_v0  ;;  %v521_v2 = vld [vmem:[#allocation9 + $0x18] sm:$0xff]  ;;  %v520_v4 = vld [vmem:[#allocation9 + $0x10] sm:$0xff]  ;;  %v597_v5 = vld [vmem:[#allocation11 + $0x8] sm:$0xff]  ;;  %vm522_vm1 = vcmask 261120   ;;  %vm750_vm2 = vcmask 64512   ;;  %s2370_s27 = smov 120  }
  0xbf   : > { %1867 = vmatprep.mubr.msk.f32.mxu1 %vm2369_vm0, %v2368_v0  ;;  %1856 = vmatprep.mubr.msk.f32.mxu0 %vm2369_vm0, %v2368_v0  ;;  %v519_v6 = vld [vmem:[#allocation9 + $0x8] sm:$0xff]  ;;  %v596_v7 = vld [vmem:[#allocation11] sm:$0xff]  ;;  %v2687_v10 = vld [vmem:[%s429_s1] sm:$0xff]  ;;  %s2371_s13 = smov 112   ;;  %s2372_s29 = smov 104   ;;  %vm1085_vm3 = vcmask 130112  }
  0xc0   : > { %1860 = vmatpush3.msra.mxu1 %v599_v1  ;;  %1849 = vmatpush3.msra.mxu0 %v521_v2  ;;  %v518_v8 = vld [vmem:[#allocation9] sm:$0xff]  ;;  %v676_v15 = vld [vmem:[#allocation12 + $0x18] sm:$0xff]  ;;  %v675_v16 = vld [vmem:[#allocation12 + $0x10] sm:$0xff]  ;;  %s1782_s26 = sshll.u32 %s2647_s0, 5  ;;  %s2373_s21 = smov 8   ;;  %vm1258_vm4 = vcmask 195712  }
  0xc1   : > { %1861 = vmatprep.subr.mxu1 %v2368_v0  ;;  %1850 = vmatprep.subr.mxu0 %v2368_v0  ;;  %v516_v9 = vld [vmem:[%s438_s18] sm:$0xff]  ;;  %v517_v19 = vld [vmem:[%s447_s24] sm:$0xff]  ;;  %s2737_s25 = scalar_lea.vmem [#allocation16], %s1782_s26  ;;  %s2374_s9 = smov 16   ;;  %vm1431_vm5 = vcmask 261312  }
  0xc2   : > { %1862 = vmatpush3.msra.mxu1 %v598_v3  ;;  %1851 = vmatpush3.msra.mxu0 %v520_v4  ;;  %v674_v17 = vld [vmem:[#allocation12 + $0x8] sm:$0xff]  ;;  %v673_v18 = vld [vmem:[#allocation12] sm:$0xff]  ;;  %s2375_s23 = smov 24   ;;  %s1811_s3 = sshll.u32 %s2455_s19, 9 }
  0xc3   : > { %1863 = vmatprep.subr.mxu1 %v2368_v0  ;;  %1852 = vmatprep.subr.mxu0 %v2368_v0  ;;  %s1574_s30 = sshll.u32 %s2737_s25, 4  ;;  %s2790_s5 = scalar_lea.hbm %s2871_s10, %s1811_s3  ;;  %s2792_s30 = int_to_ptr.vmem [resolvable:$true] %s1574_s30 }
  0xc4   : > { %1864 = vmatpush3.msra.mxu1 %v597_v5  ;;  %1853 = vmatpush3.msra.mxu0 %v519_v6  ;;  %s1548_s12 = scalar_lea.sflag [#allocation17], %s2647_s0  ;;  %s2251_s1 = scalar_lea.vmem %s2792_s30, 512 }
  0xc5   : > { %1865 = vmatprep.subr.mxu1 %v2368_v0  ;;  %1854 = vmatprep.subr.mxu0 %v2368_v0  ;;  %p2252_p5 = scmp.ne.s32.totalorder %s2792_s30, %s2251_s1  ;;  %p2926_p1 = scmp.ne.s32.totalorder %s2906_s28, 0 }
  0xc6   : > { %1866 = vmatpush3.msra.mxu1 %v596_v7  ;;  %1855 = vmatpush3.msra.mxu0 %v518_v8  ;;  %s2376_s20 = smov [#allocation16]  }
  0xc7   : > { %1868 = vmatmul.mubr.msk.f32.vlgmr.msra.gmra.mxu1 %vm522_vm1, %v516_v9  ;;  %1857 = vmatmul.mubr.msk.f32.vlgmr.msra.gmra.mxu0 %vm522_vm1, %v2687_v10  ;;  %p2253_p8 = pnand %p2252_p5, %p2926_p1  ;;  %s2255_s17 = sshll.u32 %s2376_s20, 4  ;;  %s2256_s17 = int_to_ptr.vmem [resolvable:$false] %s2255_s17 }
  0xc8   : > { %1881 = vmatprep.subr.mxu1 %v2368_v0  ;;  %1883 = vmatprep.mubr.msk.f32.mxu1 %vm2369_vm0, %v2368_v0  ;;  %s2257_s18 = scalar_lea.vmem %s2256_s17, 1024  ;;  %p2258_p11 = scmp.lt.s32.totalorder %s2792_s30, %s2256_s17 }
  0xc9   : > { %1870 = vmatprep.subr.mxu0 %v2368_v0  ;;  %1878 = vmatprep.mubr.msk.f32.mxu0 %vm2369_vm0, %v2368_v0  ;;  %p2254_p10 = pneg %p2253_p8  ;;  %p2259_p0 = scmp.lt.s32.totalorder %s2257_s18, %s2251_s1 }
  0xca   : > { %1871 = vmatpush3.msra.mxu0 %v676_v15  ;;  %v1437_v15 = vld [vmem:[#allocation14 + $0x18] sm:$0xff] }
  0xcb   : > { %1872 = vmatprep.subr.mxu0 %v2368_v0  ;;  %p2260_p4 = por %p2259_p0, %p2258_p11 }
  0xcc   : > { %1873 = vmatpush3.msra.mxu0 %v675_v16  ;;  %v1436_v16 = vld [vmem:[#allocation14 + $0x10] sm:$0xff] }
  0xcd   : > { %1874 = vmatprep.subr.mxu0 %v2368_v0  ;;  %p2261_p7 = pnand %p2260_p4, %p2254_p10 }
  0xce   : > { %1875 = vmatpush3.msra.mxu0 %v674_v17  ;;  %v1435_v17 = vld [vmem:[#allocation14 + $0x8] sm:$0xff] }
  0xcf   : > { %1876 = vmatprep.subr.mxu0 %v2368_v0 }
  0xd0   : > { %1877 = vmatpush3.msra.mxu0 %v673_v18 }
  0xd1   : > { %1879 = vmatmul.mubr.msk.f32.vlgmr.msra.gmra.mxu0 %vm522_vm1, %v517_v19  ;;  %1901 = vmatprep.subr.mxu0 %v2368_v0  ;;  %v1434_v19 = vld [vmem:[#allocation14] sm:$0xff] }
  0xd2   : > { %1903 = vmatprep.mubr.msk.f32.mxu0 %vm2369_vm0, %v2368_v0 }
 0x187   : > { %v669_v11 = vpop.f32.mrf.mxu1  ;;  %v592_v12 = vpop.f32.mrf.mxu0 }
 0x188   : > { %915 = vrot.lane.b32.xlu1 %v669_v11, %s2370_s27  ;;  %1882 = vmatpush3.xpose.msk.msra.mxu1 %vm750_vm2, %v669_v11 }
 0x189   : > { %v1869_v13 = vpop.f32.mrf.mxu1  ;;  %v1858_v14 = vpop.f32.mrf.mxu0  ;;  %1886 = vmatprep.subr.mxu1 %v2368_v0 }
 0x18b   : > { %1884 = vmatmul.mubr.msk.f32.vlgmr.msra.gmra.mxu1 %vm750_vm2, %v592_v12 }
 0x18c   : > { %913 = vrot.lane.b32.xlu1 %v592_v12, %s2370_s27  ;;  %1888 = vmatprep.mubr.msk.f32.mxu1 %vm2369_vm0, %v2368_v0 }
 0x190   : > { %1087 = vrot.lane.b32.xlu1 %v592_v12, %s2371_s13 }
 0x191   : > { %v2721_v28 = vpop.f32.mrf.mxu0 }
 0x192   : > { %1887 = vmatpush3.msra.mxu1 %v2721_v28 }
 0x193   : > { %v1880_v29 = vpop.f32.mrf.mxu0  ;;  %1891 = vmatprep.subr.mxu1 %v2368_v0 }
 0x194   : > { %1262 = vrot.lane.b32.xlu1 %v669_v11, %s2372_s29 }
 0x198   : > { %1260 = vrot.lane.b32.xlu1 %v592_v12, %s2372_s29 }
 0x1fa   : > { %v916_v30 = vpop.permute.xlu1 %915 }
 0x1fe   : > { %v914_v31 = vpop.permute.xlu1 %913 }
 0x202   : > { %v1088_v32 = vpop.permute.xlu1 %1087 }
 0x206   : > { %v1263_v35 = vpop.permute.xlu1 %1262 }
 0x20a   : > { %v1261_v36 = vpop.permute.xlu1 %1260 }
 0x24b   : > { %v823_v20 = vpop.f32.mrf.mxu1 }
 0x24c   : > { %v827_v21 = vsel %vm750_vm2, %v823_v20, -inf }
 0x24d   : > { %828 = vmax.xlane.f32.xlu0 %v827_v21  ;;  %v1885_v22 = vpop.f32.mrf.mxu1 }
 0x2d6   : > { %v829_v23 = vpop.xlane.xlu0 %828 }
 0x2d7   : > { %v830_v24 = vsub.f32 %v823_v20, %v829_v23 }
 0x2d9   : > { %v831_v25 = vmul.f32 1.442695, %v830_v24 }
 0x2db   : > { %2045 = vpow2.f32 %v831_v25 }
 0x2e8   : > { %v2046_v26 = vpop.eup %2045 }
 0x2e9   : > { %v833_v27 = vsel %vm750_vm2, %v2046_v26, 0.0 }
 0x2ea   : > { %834 = vadd.xlane.f32.xlu0 %v833_v27 }
 0x300   : > { %1089 = vrot.lane.b32.xlu0 %v669_v11, %s2371_s13 }
 0x373   : > { %v835_v33 = vpop.xlane.xlu0 %834 }
 0x374   : > { %2047 = vrcp.f32 %v835_v33 }
 0x377   : > { %v1090_v34 = vpop.permute.xlu0 %1089 }
 0x378   : > { %1902 = vmatpush3.xpose.msk.msra.mxu0 %vm750_vm2, %v1090_v34 }
 0x379   : > { %1911 = vmatprep.subr.mxu0 %v2368_v0 }
 0x37b   : > { %1904 = vmatmul.mubr.msk.f32.vlgmr.msra.gmra.mxu0 %vm750_vm2, %v1088_v32 }
 0x37c   : > { %1912 = vmatpush3.xpose.msk.msra.mxu0 %vm750_vm2, %v1263_v35  ;;  %1913 = vmatprep.mubr.msk.f32.mxu0 %vm2369_vm0, %v2368_v0 }
 0x37d   : > { %1921 = vmatprep.subr.mxu0 %v2368_v0 }
 0x37f   : > { %1914 = vmatmul.mubr.msk.f32.vlgmr.msra.gmra.mxu0 %vm750_vm2, %v1261_v36 }
 0x380   : > { %1929 = vmatprep.mubr.msk.f32.mxu0 %vm2369_vm0, %v2368_v0  ;;  %1922 = vmatpush3.msra.mxu0 %v1437_v15 }
 0x381   : > { %v2048_v37 = vpop.eup %2047  ;;  %1923 = vmatprep.subr.mxu0 %v2368_v0 }
 0x382   : > { %v837_v38 = vmul.f32 %v2048_v37, %v2046_v26  ;;  %1924 = vmatpush3.msra.mxu0 %v1436_v16 }
 0x383   : > { %1925 = vmatprep.subr.mxu0 %v2368_v0 }
 0x384   : > { %838 = vst.msk [vmem:[%s2737_s25] sm:$0xff] %vm750_vm2, %v837_v38  ;;  %1889 = vmatmul.mubr.msk.f32.vlgmr.msra.gmra.mxu1 %vm750_vm2, %v837_v38  ;;  %1926 = vmatpush3.msra.mxu0 %v1435_v17 }
 0x385   : > { %1892 = vmatpush3.xpose.msk.msra.mxu1 %vm750_vm2, %v916_v30  ;;  %1893 = vmatprep.mubr.msk.f32.mxu1 %vm2369_vm0, %v2368_v0 }
 0x386   : > { %1896 = vmatprep.subr.mxu1 %v2368_v0  ;;  %1927 = vmatprep.subr.mxu0 %v2368_v0 }
 0x387   : > { %1928 = vmatpush3.msra.mxu0 %v1434_v19 }
 0x388   : > { %1894 = vmatmul.mubr.msk.f32.vlgmr.msra.gmra.mxu1 %vm750_vm2, %v914_v31 }
 0x389   : > { %1898 = vmatprep.mubr.msk.f32.mxu1 %vm2369_vm0, %v2368_v0 }
 0x43b   : > { %v1161_v39 = vpop.f32.mrf.mxu0 }
 0x43c   : > { %v1165_v40 = vsel %vm750_vm2, %v1161_v39, -inf }
 0x43d   : > { %1166 = vmax.xlane.f32.xlu0 %v1165_v40  ;;  %v1905_v41 = vpop.f32.mrf.mxu0 }
 0x43f   : > { %v1334_v42 = vpop.f32.mrf.mxu0 }
 0x440   : > { %v1338_v49 = vsel %vm750_vm2, %v1334_v42, -inf }
 0x441   : > { %v1915_v43 = vpop.f32.mrf.mxu0 }
 0x444   : > { %v908_v44 = vpop.f32.mrf.mxu1 }
 0x445   : > { %912 = vst.msk [vmem:[#allocation2] sm:$0xff] %vm750_vm2, %v908_v44 }
 0x446   : > { %v1890_v45 = vpop.f32.mrf.mxu1 }
 0x448   : > { %v987_v46 = vpop.f32.mrf.mxu1 }
 0x449   : > { %v991_v47 = vsel %vm750_vm2, %v987_v46, -inf }
 0x44a   : > { %992 = vmax.xlane.f32.xlu1 %v991_v47  ;;  %v1895_v48 = vpop.f32.mrf.mxu1 }
 0x44e   : > { %1339 = vmax.xlane.f32.xlu1 %v1338_v49 }
 0x4c6   : > { %v1167_v50 = vpop.xlane.xlu0 %1166 }
 0x4c7   : > { %v1168_v51 = vsub.f32 %v1161_v39, %v1167_v50 }
 0x4c9   : > { %v1169_v52 = vmul.f32 1.442695, %v1168_v51 }
 0x4cb   : > { %2049 = vpow2.f32 %v1169_v52 }
 0x4d3   : > { %v993_v53 = vpop.xlane.xlu1 %992 }
 0x4d4   : > { %v994_v61 = vsub.f32 %v987_v46, %v993_v53 }
 0x4d6   : > { %v995_v62 = vmul.f32 1.442695, %v994_v61 }
 0x4d7   : > { %v1340_v54 = vpop.xlane.xlu1 %1339 }
 0x4d8   : > { %v2050_v55 = vpop.eup %2049  ;;  %v1341_v56 = vsub.f32 %v1334_v42, %v1340_v54 }
 0x4d9   : > { %v1171_v57 = vsel %vm750_vm2, %v2050_v55, 0.0 }
 0x4da   : > { %v1342_v58 = vmul.f32 1.442695, %v1341_v56  ;;  %1172 = vadd.xlane.f32.xlu0 %v1171_v57 }
 0x4dc   : > { %2051 = vpow2.f32 %v1342_v58 }
 0x4dd   : > { %2053 = vpow2.f32 %v995_v62 }
 0x4e9   : > { %v2052_v59 = vpop.eup %2051 }
 0x4ea   : > { %v1344_v60 = vsel %vm750_vm2, %v2052_v59, 0.0  ;;  %v2054_v63 = vpop.eup %2053 }
 0x4eb   : > { %1345 = vadd.xlane.f32.xlu1 %v1344_v60  ;;  %v997_v1 = vsel %vm750_vm2, %v2054_v63, 0.0 }
 0x4f0   : > { %1005 = vrot.lane.b32.xlu0 %v2721_v28, %s2370_s27 }
 0x4fc   : > { %1178 = vrot.lane.b32.xlu1 %v2721_v28, %s2371_s13 }
 0x520   : > { %998 = vadd.xlane.f32.xlu1 %v997_v1 }
 0x531   : > { %1351 = vrot.lane.b32.xlu1 %v2721_v28, %s2372_s29 }
 0x563   : > { %v1173_v2 = vpop.xlane.xlu0 %1172 }
 0x564   : > { %2055 = vrcp.f32 %v1173_v2 }
 0x567   : > { %v1006_v3 = vpop.permute.xlu0 %1005 }
 0x568   : > { %1897 = vmatpush3.msra.mxu1 %v1006_v3 }
 0x569   : > { %1906 = vmatprep.subr.mxu1 %v2368_v0 }
 0x571   : > { %v2056_v4 = vpop.eup %2055 }
 0x572   : > { %v1175_v5 = vmul.f32 %v2056_v4, %v2050_v55 }
 0x574   : > { %v1346_v6 = vpop.xlane.xlu1 %1345  ;;  %1795 = vst.msk [vmem:[%s2737_s25 + $0x10] sm:$0xff] %vm750_vm2, %v1175_v5 }
 0x575   : > { %2057 = vrcp.f32 %v1346_v6 }
 0x578   : > { %v1179_v9 = vpop.permute.xlu1 %1178 }
 0x582   : > { %v2058_v7 = vpop.eup %2057 }
 0x583   : > { %v1348_v8 = vmul.f32 %v2058_v7, %v2052_v59 }
 0x585   : > { %1799 = vst.msk [vmem:[%s2737_s25 + $0x18] sm:$0xff] %vm750_vm2, %v1348_v8 }
 0x5a9   : > { %v999_v11 = vpop.xlane.xlu1 %998 }
 0x5aa   : > { %2059 = vrcp.f32 %v999_v11 }
 0x5ad   : > { %v1352_v14 = vpop.permute.xlu1 %1351 }
 0x5b7   : > { %v2060_v12 = vpop.eup %2059 }
 0x5b8   : > { %v1001_v13 = vmul.f32 %v2060_v12, %v2054_v63 }
 0x5ba   : > { %1791 = vst.msk [vmem:[%s2737_s25 + $0x8] sm:$0xff] %vm750_vm2, %v1001_v13  ;;  %1899 = vmatmul.mubr.msk.f32.vlgmr.msra.gmra.mxu1 %vm750_vm2, %v1001_v13 }
 0x5bb   : > { %1907 = vmatpush3.msra.mxu1 %v1179_v9  ;;  %1908 = vmatprep.mubr.msk.f32.mxu1 %vm2369_vm0, %v2368_v0 }
 0x5bc   : > { %1916 = vmatprep.subr.mxu1 %v2368_v0 }
 0x5be   : > { %1909 = vmatmul.mubr.msk.f32.vlgmr.msra.gmra.mxu1 %vm750_vm2, %v1175_v5 }
 0x5bf   : > { %1917 = vmatpush3.msra.mxu1 %v1352_v14  ;;  %1918 = vmatprep.mubr.msk.f32.mxu1 %vm2369_vm0, %v2368_v0 }
 0x5c2   : > { %1919 = vmatmul.mubr.msk.f32.vlgmr.msra.gmra.mxu1 %vm750_vm2, %v1348_v8 }
 0x67a   : > { %v1077_v18 = vpop.f32.mrf.mxu1 }
 0x67b   : > { %1082 = vrot.lane.b32.xlu0 %v1077_v18, %s2373_s21 }
 0x67c   : > { %v1900_v20 = vpop.f32.mrf.mxu1 }
 0x67e   : > { %v1250_v21 = vpop.f32.mrf.mxu1 }
 0x67f   : > { %1255 = vrot.lane.b32.xlu1 %v1250_v21, %s2374_s9 }
 0x680   : > { %v1910_v22 = vpop.f32.mrf.mxu1 }
 0x682   : > { %v1423_v23 = vpop.f32.mrf.mxu1 }
 0x683   : > { %1428 = vrot.lane.b32.xlu0 %v1423_v23, %s2375_s23 }
 0x684   : > { %v1920_v24 = vpop.f32.mrf.mxu1 }
 0x6ed   : > { %v1083_v25 = vpop.permute.xlu0 %1082 }
 0x6ee   : > { %1086 = vst.msk [vmem:[#allocation2] sm:$0xff] %vm1085_vm3, %v1083_v25 }
 0x6f1   : > { %v1256_v26 = vpop.permute.xlu1 %1255 }
 0x6f2   : > { %1259 = vst.msk [vmem:[#allocation2] sm:$0xff] %vm1258_vm4, %v1256_v26 }
 0x6f5   : > { %v1429_v27 = vpop.permute.xlu0 %1428 }
 0x6f6   : > { %1432 = vst.msk [vmem:[#allocation2] sm:$0xff] %vm1431_vm5, %v1429_v27 }
 0x6fd   : > { %v1433_v0 = vld [vmem:[#allocation2] sm:$0xff] }
 0x6fe   : > { %1930 = vmatmul.mubr.msk.f32.vlgmr.msra.gmra.mxu0 %vm522_vm1, %v1433_v0 }
 0x7be   : > { %v1507_v28 = vpop.f32.mrf.mxu0 }
 0x7bf   : > { %v1508_v29 = vadd.f32 %v1507_v28, %v2687_v10 }
 0x7c0   : > { %v1931_v30 = vpop.f32.mrf.mxu0 }
 0x7c1   : > { %v1511_v31 = vsel %vm522_vm1, %v1508_v29, 0.0 }
 0x7c2   : > { %1512 = vadd.xlane.f32.xlu1 %v1511_v31 }
 0x84b   : > { %v1513_v32 = vpop.xlane.xlu1 %1512 }
 0x84c   : > { %v1515_v33 = vmul.f32 0.03125, %v1513_v32 }
 0x84e   : > { %v1516_v34 = vsub.f32 %v1508_v29, %v1515_v33 }
 0x850   : > { %v1517_v35 = vmul.f32 %v1516_v34, %v1516_v34 }
 0x852   : > { %v1518_v36 = vsel %vm522_vm1, %v1517_v35, 0.0 }
 0x853   : > { %1519 = vadd.xlane.f32.xlu0 %v1518_v36 }
 0x854   : > { %2264 = shalt.err (!%p2261_p7)
}
 0x855   : > { %s2265_s24 = scalar_lea.hbm %s2790_s5, 512  ;;  %s2269_s29 = scalar_lea.hbm %s2871_s10, 1024 }
 0x856   : > { %p2266_p3 = scmp.ne.s32.totalorder %s2790_s5, %s2265_s24  ;;  %p2270_p6 = scmp.lt.s32.totalorder %s2790_s5, %s2871_s10 }
 0x857   : > { %p2271_p9 = scmp.lt.s32.totalorder %s2269_s29, %s2265_s24 }
 0x858   : > { %p2267_p12 = pnand %p2266_p3, %p2926_p1 }
 0x859   : > { %p2272_p2 = por %p2271_p9, %p2270_p6 }
 0x85a   : > { %p2268_p13 = pneg %p2267_p12 }
 0x85c   : > { %p2273_p5 = pnand %p2272_p2, %p2268_p13 }
 0x85e   : > { %2276 = shalt.err (!%p2273_p5)
}
 0x85f   : > { %s2377_s9 = smov 128   ;;  %v1802_v40 = vld [vmem:[%s2868_s7] ss:$0 sm:$0xff]  ;;  %s1806_s1 = sshll.u32 %s2455_s19, 7 }
 0x860   : > { %1955 = dma.vmem_to_hbm [thread:$0]  (%p2926_p1), %s2792_s30, 512, %s2790_s5, %s1548_s12, %s2377_s9, %s2377_s9, %s2373_s21  }
 0x861   : > { %v1803_v42 = vld [vmem:[%s2869_s8] ss:$0 sm:$0xff]  ;;  %s507_s20 = scalar_lea.vmem [#allocation15], %s2650_s16  ;;  %s2927_s5 = sld [smem:[#allocation33_spill]] }
 0x862   : > { %s1561_s17 = sshll.u32 %s507_s20, 4  ;;  %s1543_s18 = scalar_lea.sflag [#allocation5], %s2647_s0  ;;  %s1562_s17 = int_to_ptr.vmem [resolvable:$true] %s1561_s17 }
 0x863   : > { %s2277_s24 = scalar_lea.vmem %s1562_s17, 128  ;;  %s2378_s27 = smov [#allocation15]  }
 0x864   : > { %p2278_p8 = scmp.ne.s32.totalorder %s1562_s17, %s2277_s24  ;;  %s2281_s13 = sshll.u32 %s2378_s27, 4  ;;  %s2282_s13 = int_to_ptr.vmem [resolvable:$false] %s2281_s13 }
 0x865   : > { %s2283_s19 = scalar_lea.vmem %s2282_s13, 256  ;;  %p2284_p0 = scmp.lt.s32.totalorder %s1562_s17, %s2282_s13 }
 0x866   : > { %p2279_p10 = pnand %p2278_p8, %p2926_p1  ;;  %p2285_p4 = scmp.lt.s32.totalorder %s2283_s19, %s2277_s24 }
 0x867   : > { %s1559_s12 = scalar_lea.hbm %s2927_s5, %s1806_s1 }
 0x868   : > { %p2280_p11 = pneg %p2279_p10  ;;  %p2286_p7 = por %p2285_p4, %p2284_p0 }
 0x86a   : > { %p2287_p3 = pnand %p2286_p7, %p2280_p11 }
 0x8dc   : > { %v1520_v10 = vpop.xlane.xlu0 %1519 }
 0x8dd   : > { %v1521_v37 = vmul.f32 0.03125, %v1520_v10 }
 0x8df   : > { %v1522_v38 = vadd.f32 1e-06, %v1521_v37 }
 0x8e1   : > { %2061 = vrsqrt.f32 %v1522_v38 }
 0x8ee   : > { %v2062_v39 = vpop.eup %2061 }
 0x8ef   : > { %v1524_v41 = vmul.f32 %v2062_v39, %v1516_v34 }
 0x8f1   : > { %v1532_v43 = vmul.f32 %v1802_v40, %v1524_v41 }
 0x8f3   : > { %v1540_v44 = vadd.f32 %v1803_v42, %v1532_v43 }
 0x8f5   : > { %1541 = vst.msk [vmem:[%s507_s20] sm:$0xff] %vm522_vm1, %v1540_v44 }
 0x8f6   : > { %2290 = shalt.err (!%p2287_p3)
}
 0x8f7   : > { %s2291_s16 = scalar_lea.hbm %s1559_s12, 128  ;;  %s2295_s26 = scalar_lea.hbm %s2927_s5, 256 }
 0x8f8   : > { %p2292_p12 = scmp.ne.s32.totalorder %s1559_s12, %s2291_s16  ;;  %p2296_p9 = scmp.lt.s32.totalorder %s1559_s12, %s2927_s5 }
 0x8f9   : > { %p2297_p2 = scmp.lt.s32.totalorder %s2295_s26, %s2291_s16 }
 0x8fa   : > { %p2293_p13 = pnand %p2292_p12, %p2926_p1 }
 0x8fb   : > { %p2298_p5 = por %p2297_p2, %p2296_p9 }
 0x8fc   : > { %p2294_p6 = pneg %p2293_p13 }
 0x8fe   : > { %p2299_p8 = pnand %p2298_p5, %p2294_p6 }
 0x900   : > { %2302 = shalt.err (!%p2299_p8)
}
 0x901   : > { %1954 = dma.vmem_to_hbm [thread:$0]  (%p2926_p1), %s1562_s17, 128, %s1559_s12, %s1543_s18  }
 0x902 PF: > { %s2928_s23 = sld [smem:[#allocation24_spill]] }
 0x903   : > { %s2929_s3 = sld [smem:[#allocation28_spill]] }
 0x904   : > { %s2930_s11 = sld [smem:[#allocation25_spill]] }
 0x908   : > { %s1589_s22 = sand.u32 1, %s2928_s23  }
 0x909   : > { %p2931_p10 = scmp.ne.s32.totalorder %s2929_s3, 0  ;;  %s1590_s1 = scalar_lea.sflag [#allocation5], %s1589_s22 }
 0x90a   : > { %p2932_p11 = scmp.ge.s32.totalorder %s2930_s11, 2 }
 0x90c   : > { %p1982_p0 = pnand %p2932_p11, %p2931_p10 }
 0x90e   : > { %p1983_p4 = pneg %p1982_p0 }
 0x910   : > { %2336 = dma.done.wait (%p1983_p4), %s1590_s1, 128  }
 0x911   : > { %2338 = vsyncadd (%p1983_p4), %s1590_s1, 4294967168  ;;  %s1599_s20 = scalar_lea.sflag [#allocation17], %s1589_s22 }
 0x912   : > { %2340 = dma.done.wait (%p1983_p4), %s1599_s20, 512  }
 0x913   : > { %2342 = vsyncadd (%p1983_p4), %s1599_s20, 4294966784  ;;  %s2933_s16 = sld [smem:[#allocation26_spill]]  ;;  %s2935_s13 = smov %s2349_s14 }
 0x914   : > { %s2934_s28 = sld [smem:[#allocation27_spill]]  ;;  %s2936_s14 = smov %s2353_s15 }
 0x919   : > { %p32_p1 = scmp.ge.s32.totalorder %s2933_s16, 4  }
 0x91a   : > { %s2937_s15 = smov %s2934_s28 }
 0x91b   :  { %34 = sbr.rel (!%p32_p1) target bundleno = 17 (0x11), region = 161 }
 0x920   :  { %1604 = vsyncpa [#allocation4], 1 }
 0x921   :  { %1606 = vsyncpa [#allocation4 + $0x1], 1 }
 0x922   :  { %1607 = vsyncpa [#allocation7], 1 }
 0x923   :  { %1609 = vsyncpa [#allocation7 + $0x1], 1 }
 0x924   :  { %1610 = vsyncpa [#allocation10], 1 }
 0x925   :  { %1611 = vsyncpa [#allocation13], 1 }
 0x926   :  { %1612 = vsyncpa [#allocation5], 1 }
 0x927   :  { %1614 = vsyncpa [#allocation5 + $0x1], 1 }
 0x928   :  { %1615 = vsyncpa [#allocation17], 1 }
 0x929   :  { %1617 = vsyncpa [#allocation17 + $0x1], 1 }

</bundles_post_ra>
